<compile_context>
chip_gen: v7x
topology: tpu7x:2x2x1
jax: 0.10.0
libtpu: 0.0.40
codegen_flags: <defaults>
</compile_context>

<pallas_src>
import functools
import math

import jax
import jax.numpy as jnp
from jax.experimental import pallas as pl
from jax.experimental.pallas import tpu as pltpu


# ------------------------------------------------------------------ kernel --

def fused_ffn_kernel(x_ref, w1_ref, b1_ref, w2_ref, b2_ref, o_ref, *, num_layers):
    """Apply all `num_layers` FFN layers to one row tile, activations on-chip.

    x_ref : (TM, Dm)  f32          w1_ref : (L, Dm, Dff)  compute dtype (bf16/f32)
    o_ref : (TM, Dm)  f32          w2_ref : (L, Dff, Dm)  compute dtype
                                   b1_ref : (L, 1, Dff)   f32
                                   b2_ref : (L, 1, Dm)    f32
    Dm / Dff are the lane-dense folded feature dims (128 / 256 here).
    """
    cdt = w1_ref.dtype                       # MXU operand dtype (bf16 fast path)
    y = x_ref[...].astype(jnp.float32)
    x = y.astype(cdt)
    for l in range(num_layers):              # static unroll: tiny L, full LLO visibility
        h = jnp.dot(x, w1_ref[l], preferred_element_type=jnp.float32) + b1_ref[l]
        h = jnp.maximum(h, 0.0).astype(cdt)
        y = jnp.dot(h, w2_ref[l], preferred_element_type=jnp.float32) + b2_ref[l]
        x = y.astype(cdt)
    o_ref[...] = y.astype(o_ref.dtype)
    # TODO(synk): dropout (p=0.7) is identity at inference; training-mode dropout
    # (and the module's dead attention/layernorm branches) are not implemented.


# --------------------------------------------------------------- parameters --

def init_linear_params(key, in_features, out_features, dtype=jnp.float32):
    """Mimic torch.nn.Linear default init (uniform +-1/sqrt(fan_in)).
    Weight stored transposed: (in_features, out_features) so x @ W."""
    kw, kb = jax.random.split(key)
    bound = 1.0 / math.sqrt(in_features)
    w = jax.random.uniform(kw, (in_features, out_features), dtype, -bound, bound)
    b = jax.random.uniform(kb, (1, out_features), dtype, -bound, bound)
    return w, b


def init_decoder_params(key, num_layers, d_model, dff, dtype=jnp.float32):
    params = []
    for lk in jax.random.split(key, num_layers):
        k1, k2 = jax.random.split(lk)
        w1, b1 = init_linear_params(k1, d_model, dff, dtype)
        w2, b2 = init_linear_params(k2, dff, d_model, dtype)
        params.append((w1, b1, w2, b2))
    return params


def prepare_decoder_params(params, d_model, *, target_lanes=128,
                           weight_dtype=jnp.bfloat16):
    """One-time weight prep, hoisted OUT of the forward pass.

    * fold = target_lanes // d_model  (lane-dense folded layout)
    * block-diagonal kron(I_fold, W) expansion: the folded matmul is exactly
      the per-token FFN (off-diagonal blocks are zero).
    * weights cast to `weight_dtype` (bf16 -> native MXU operands); biases f32.
    Returns (w1s, b1s, w2s, b2s) with shapes
      (L, fold*d_model, fold*dff), (L, 1, fold*dff),
      (L, fold*dff, fold*d_model), (L, 1, fold*d_model).
    """
    if d_model <= target_lanes and target_lanes % d_model == 0:
        fold = target_lanes // d_model
    else:
        fold = 1                      # general fallback (not hit for d_model=32)
    eye = jnp.eye(fold, dtype=jnp.float32)
    w1s = jnp.stack([jnp.kron(eye, w1.astype(jnp.float32))
                     for (w1, _, _, _) in params]).astype(weight_dtype)
    b1s = jnp.stack([jnp.tile(b1.astype(jnp.float32), (1, fold))
                     for (_, b1, _, _) in params])
    w2s = jnp.stack([jnp.kron(eye, w2.astype(jnp.float32))
                     for (_, _, w2, _) in params]).astype(weight_dtype)
    b2s = jnp.stack([jnp.tile(b2.astype(jnp.float32), (1, fold))
                     for (_, _, _, b2) in params])
    return (w1s, b1s, w2s, b2s)


# ------------------------------------------------------------------ forward --

_TM_MAX = 2048      # folded rows per grid step (~1 MiB f32 per in/out buffer)
_ROW_GRP = 16       # folded-row padding granularity (=> tm multiple of 8, even 2-way split)


def _round_up(a, m):
    return (a + m - 1) // m * m


def _resident_spec(shape):
    """Constant-block-index spec: fetched once, stays resident across the grid.
    Single-buffered when the jax version supports pipeline_mode (weights never
    change, so a second buffer is pure VMEM waste)."""
    index_map = lambda i: (0,) * len(shape)
    try:
        return pl.BlockSpec(shape, index_map, pipeline_mode=pl.Buffered(1))
    except Exception:
        return pl.BlockSpec(shape, index_map)


def decoder_forward(x, memory, prepared_weights,
                    look_ahead_mask=None, trg_padding_mask=None):
    """Pallas-backed Decoder.forward.

    `memory` and the masks are accepted but unused — in the source module the
    DecoderLayer.forward only applies `self.ffn(x)`, so attention, layernorms,
    memory and masks are intentionally dead code here as well.
    """
    del memory, look_ahead_mask, trg_padding_mask
    w1s, b1s, w2s, b2s = prepared_weights
    b, s, d_model = x.shape
    num_layers, dfm, dffb = w1s.shape
    fold = dfm // d_model
    n = b * s

    # ---- explicit zero-padding: lane-dense fold always, every tile full, grid >= 2
    nf = _round_up(pl.cdiv(n, fold), _ROW_GRP)
    if nf <= 2 * _TM_MAX:
        tm = max(_ROW_GRP // 2, nf // 2)      # two balanced tiles -> both TCs busy
    else:
        tm = _TM_MAX                          # big tile amortizes per-step overhead
    grid_m = pl.cdiv(nf, tm)
    nf = grid_m * tm
    n_pad = nf * fold

    x2 = x.reshape(n, d_model)
    if n_pad != n:
        x2 = jnp.pad(x2, ((0, n_pad - n), (0, 0)))
    xf = x2.reshape(nf, dfm)                  # row-major fold: `fold` tokens per 128-lane row

    out = pl.pallas_call(
        functools.partial(fused_ffn_kernel, num_layers=num_layers),
        out_shape=jax.ShapeDtypeStruct((nf, dfm), x.dtype),
        grid=(grid_m,),
        in_specs=[
            pl.BlockSpec((tm, dfm), lambda i: (i, 0)),          # activation row tile
            _resident_spec((num_layers, dfm, dffb)),            # w1 (resident)
            _resident_spec((num_layers, 1, dffb)),              # b1 (resident)
            _resident_spec((num_layers, dffb, dfm)),            # w2 (resident)
            _resident_spec((num_layers, 1, dfm)),               # b2 (resident)
        ],
        out_specs=pl.BlockSpec((tm, dfm), lambda i: (i, 0)),
        compiler_params=pltpu.CompilerParams(
            dimension_semantics=("parallel",),                  # shard row tiles across TCs
            vmem_limit_bytes=32 * 1024 * 1024),                 # explicit (v5e default is 16 MiB)
    )(xf, w1s, b1s, w2s, b2s)

    y = out.reshape(n_pad, d_model)[:n]
    return y.reshape(b, s, d_model)


def decoder_forward_ref(x, memory, params, look_ahead_mask=None, trg_padding_mask=None):
    """Plain-JAX f32 reference for correctness checking."""
    y = x
    for (w1, b1, w2, b2) in params:
        h = jnp.maximum(jnp.einsum("bsd,df->bsf", y, w1) + b1[0], 0.0)
        y = jnp.einsum("bsf,fd->bsd", h, w2) + b2[0]
    return y


# --------------------------------------------------------------------- main --

if __name__ == "__main__":
    # Small shapes consistent with the module.
    num_layers = 2
    d_model = 32
    num_heads = 4      # unused by forward (attention is dead code in the source module)
    dff = 64
    num_classes = 10   # unused by forward, kept for signature fidelity
    batch, seq = 2, 8

    key = jax.random.PRNGKey(0)
    kx, km, kp = jax.random.split(key, 3)
    x = jax.random.normal(kx, (batch, seq, d_model), jnp.float32)
    memory = jax.random.normal(km, (batch, seq, d_model), jnp.float32)  # unused
    params = init_decoder_params(kp, num_layers, d_model, dff)
    ref = decoder_forward_ref(x, memory, params)

    fwd = jax.jit(decoder_forward)

    # --- f32-weight path: exact check against the plain-JAX reference.
    prep_f32 = prepare_decoder_params(params, d_model, weight_dtype=jnp.float32)
    out_f32 = jax.block_until_ready(fwd(x, memory, prep_f32))
    assert out_f32.shape == (batch, seq, d_model)
    assert jnp.allclose(out_f32, ref, atol=1e-4, rtol=1e-4), "f32 path mismatch vs reference"

    # --- bf16-weight path (default / fast path): MXU-native operands, f32 accumulation.
    prep_bf16 = prepare_decoder_params(params, d_model)        # weight_dtype=bf16
    out_bf16 = jax.block_until_ready(fwd(x, memory, prep_bf16))
    assert out_bf16.shape == (batch, seq, d_model)
    assert jnp.allclose(out_bf16, ref, atol=5e-2, rtol=5e-2), "bf16 path mismatch vs reference"

    print("KERNEL_OK")
</pallas_src>

<mosaic_0001>
module attributes {stable_mosaic.version = 11 : i64} {
  func.func @fused_ffn_kernel(%arg0: i32, %arg1: memref<8x128xf32, #tpu.memory_space<vmem>>, %arg2: memref<2x128x256xf32, #tpu.memory_space<vmem>>, %arg3: memref<2x1x256xf32, #tpu.memory_space<vmem>>, %arg4: memref<2x256x128xf32, #tpu.memory_space<vmem>>, %arg5: memref<2x1x128xf32, #tpu.memory_space<vmem>>, %arg6: memref<8x128xf32, #tpu.memory_space<vmem>>) attributes {dimension_semantics = [#tpu.dimension_semantics<parallel>], iteration_bounds = array<i64: 2>, scalar_prefetch = 0 : i64, scratch_operands = 0 : i64, tpu.core_type = #tpu.core_type<tc>, window_params = [{transform_indices = @transform_0, window_bounds = array<i64: 8, 128>}, {pipeline_mode = #tpu.pipeline_mode<synchronous>, transform_indices = @transform_1, window_bounds = array<i64: 2, 128, 256>}, {pipeline_mode = #tpu.pipeline_mode<synchronous>, transform_indices = @transform_2, window_bounds = array<i64: 2, 1, 256>}, {pipeline_mode = #tpu.pipeline_mode<synchronous>, transform_indices = @transform_3, window_bounds = array<i64: 2, 256, 128>}, {pipeline_mode = #tpu.pipeline_mode<synchronous>, transform_indices = @transform_4, window_bounds = array<i64: 2, 1, 128>}, {transform_indices = @transform_5, window_bounds = array<i64: 8, 128>}]} {
    %c0 = arith.constant 0 : index
    %c0_0 = arith.constant 0 : index
    %0 = vector.load %arg1[%c0, %c0_0] : memref<8x128xf32, #tpu.memory_space<vmem>>, vector<8x128xf32>
    %c0_1 = arith.constant 0 : index
    %c0_2 = arith.constant 0 : index
    %c0_3 = arith.constant 0 : index
    %1 = vector.load %arg2[%c0_1, %c0_2, %c0_3] : memref<2x128x256xf32, #tpu.memory_space<vmem>>, vector<1x128x256xf32>
    %2 = vector.shape_cast %1 : vector<1x128x256xf32> to vector<128x256xf32>
    %cst = arith.constant dense<0.000000e+00> : vector<8x256xf32>
    %3 = tpu.matmul %0, %2, %cst {dimension_numbers = #tpu.dot_dimension_numbers<[1], [0], [0], [1], [0, 0, 1, 1], [], []>} : vector<8x128xf32>, vector<128x256xf32>, vector<8x256xf32> -> vector<8x256xf32>
    %c0_4 = arith.constant 0 : index
    %c0_5 = arith.constant 0 : index
    %c0_6 = arith.constant 0 : index
    %4 = vector.load %arg3[%c0_4, %c0_5, %c0_6] : memref<2x1x256xf32, #tpu.memory_space<vmem>>, vector<1x1x256xf32>
    %5 = vector.shape_cast %4 : vector<1x1x256xf32> to vector<1x256xf32>
    %6 = vector.broadcast %5 : vector<1x256xf32> to vector<8x256xf32>
    %7 = arith.addf %3, %6 : vector<8x256xf32>
    %cst_7 = arith.constant 0.000000e+00 : f32
    %8 = vector.broadcast %cst_7 : f32 to vector<8x256xf32>
    %9 = arith.maximumf %7, %8 : vector<8x256xf32>
    %c0_8 = arith.constant 0 : index
    %c0_9 = arith.constant 0 : index
    %c0_10 = arith.constant 0 : index
    %10 = vector.load %arg4[%c0_8, %c0_9, %c0_10] : memref<2x256x128xf32, #tpu.memory_space<vmem>>, vector<1x256x128xf32>
    %11 = vector.shape_cast %10 : vector<1x256x128xf32> to vector<256x128xf32>
    %cst_11 = arith.constant dense<0.000000e+00> : vector<8x128xf32>
    %12 = tpu.matmul %9, %11, %cst_11 {dimension_numbers = #tpu.dot_dimension_numbers<[1], [0], [0], [1], [0, 0, 1, 1], [], []>} : vector<8x256xf32>, vector<256x128xf32>, vector<8x128xf32> -> vector<8x128xf32>
    %c0_12 = arith.constant 0 : index
    %c0_13 = arith.constant 0 : index
    %c0_14 = arith.constant 0 : index
    %13 = vector.load %arg5[%c0_12, %c0_13, %c0_14] : memref<2x1x128xf32, #tpu.memory_space<vmem>>, vector<1x1x128xf32>
    %14 = vector.shape_cast %13 : vector<1x1x128xf32> to vector<1x128xf32>
    %15 = vector.broadcast %14 : vector<1x128xf32> to vector<8x128xf32>
    %16 = arith.addf %12, %15 : vector<8x128xf32>
    %c1 = arith.constant 1 : index
    %c0_15 = arith.constant 0 : index
    %c0_16 = arith.constant 0 : index
    %17 = vector.load %arg2[%c1, %c0_15, %c0_16] : memref<2x128x256xf32, #tpu.memory_space<vmem>>, vector<1x128x256xf32>
    %18 = vector.shape_cast %17 : vector<1x128x256xf32> to vector<128x256xf32>
    %cst_17 = arith.constant dense<0.000000e+00> : vector<8x256xf32>
    %19 = tpu.matmul %16, %18, %cst_17 {dimension_numbers = #tpu.dot_dimension_numbers<[1], [0], [0], [1], [0, 0, 1, 1], [], []>} : vector<8x128xf32>, vector<128x256xf32>, vector<8x256xf32> -> vector<8x256xf32>
    %c1_18 = arith.constant 1 : index
    %c0_19 = arith.constant 0 : index
    %c0_20 = arith.constant 0 : index
    %20 = vector.load %arg3[%c1_18, %c0_19, %c0_20] : memref<2x1x256xf32, #tpu.memory_space<vmem>>, vector<1x1x256xf32>
    %21 = vector.shape_cast %20 : vector<1x1x256xf32> to vector<1x256xf32>
    %22 = vector.broadcast %21 : vector<1x256xf32> to vector<8x256xf32>
    %23 = arith.addf %19, %22 : vector<8x256xf32>
    %cst_21 = arith.constant 0.000000e+00 : f32
    %24 = vector.broadcast %cst_21 : f32 to vector<8x256xf32>
    %25 = arith.maximumf %23, %24 : vector<8x256xf32>
    %c1_22 = arith.constant 1 : index
    %c0_23 = arith.constant 0 : index
    %c0_24 = arith.constant 0 : index
    %26 = vector.load %arg4[%c1_22, %c0_23, %c0_24] : memref<2x256x128xf32, #tpu.memory_space<vmem>>, vector<1x256x128xf32>
    %27 = vector.shape_cast %26 : vector<1x256x128xf32> to vector<256x128xf32>
    %cst_25 = arith.constant dense<0.000000e+00> : vector<8x128xf32>
    %28 = tpu.matmul %25, %27, %cst_25 {dimension_numbers = #tpu.dot_dimension_numbers<[1], [0], [0], [1], [0, 0, 1, 1], [], []>} : vector<8x256xf32>, vector<256x128xf32>, vector<8x128xf32> -> vector<8x128xf32>
    %c1_26 = arith.constant 1 : index
    %c0_27 = arith.constant 0 : index
    %c0_28 = arith.constant 0 : index
    %29 = vector.load %arg5[%c1_26, %c0_27, %c0_28] : memref<2x1x128xf32, #tpu.memory_space<vmem>>, vector<1x1x128xf32>
    %30 = vector.shape_cast %29 : vector<1x1x128xf32> to vector<1x128xf32>
    %31 = vector.broadcast %30 : vector<1x128xf32> to vector<8x128xf32>
    %32 = arith.addf %28, %31 : vector<8x128xf32>
    %c0_29 = arith.constant 0 : index
    %c0_30 = arith.constant 0 : index
    %33 = vector.load %arg6[%c0_29, %c0_30] : memref<8x128xf32, #tpu.memory_space<vmem>>, vector<8x128xf32>
    tpu.vector_store %arg6[%c0_29, %c0_30], %32 {strides = array<i32>} : memref<8x128xf32, #tpu.memory_space<vmem>>, vector<8x128xf32>,
    return
  }
  func.func @transform_0(%arg0: i32) -> (i32, i32) {
    %c0_i32 = arith.constant 0 : i32
    %c0_i32_0 = arith.constant 0 : i32
    return %arg0, %c0_i32 : i32, i32
  }
  func.func @transform_1(%arg0: i32) -> (i32, i32, i32) {
    %c0_i32 = arith.constant 0 : i32
    %c0_i32_0 = arith.constant 0 : i32
    %c0_i32_1 = arith.constant 0 : i32
    %c0_i32_2 = arith.constant 0 : i32
    return %c0_i32, %c0_i32_0, %c0_i32_1 : i32, i32, i32
  }
  func.func @transform_2(%arg0: i32) -> (i32, i32, i32) {
    %c0_i32 = arith.constant 0 : i32
    %c0_i32_0 = arith.constant 0 : i32
    %c0_i32_1 = arith.constant 0 : i32
    %c0_i32_2 = arith.constant 0 : i32
    return %c0_i32, %c0_i32_0, %c0_i32_1 : i32, i32, i32
  }
  func.func @transform_3(%arg0: i32) -> (i32, i32, i32) {
    %c0_i32 = arith.constant 0 : i32
    %c0_i32_0 = arith.constant 0 : i32
    %c0_i32_1 = arith.constant 0 : i32
    %c0_i32_2 = arith.constant 0 : i32
    return %c0_i32, %c0_i32_0, %c0_i32_1 : i32, i32, i32
  }
  func.func @transform_4(%arg0: i32) -> (i32, i32, i32) {
    %c0_i32 = arith.constant 0 : i32
    %c0_i32_0 = arith.constant 0 : i32
    %c0_i32_1 = arith.constant 0 : i32
    %c0_i32_2 = arith.constant 0 : i32
    return %c0_i32, %c0_i32_0, %c0_i32_1 : i32, i32, i32
  }
  func.func @transform_5(%arg0: i32) -> (i32, i32) {
    %c0_i32 = arith.constant 0 : i32
    %c0_i32_0 = arith.constant 0 : i32
    return %arg0, %c0_i32 : i32, i32
  }
}

</mosaic_0001>

<bundles_post_ra>
// kernel: decoder_forward.1
= control target key start
LH: loop header
LB: loop body
LE: loop exit
PB: predicated region body
PF: predicated region fallthrough
CT: control target
= control target key end

     0   :  { %10 = vsyncpa [#allocation3], 0  ;;  %s1269_s0 = inlined_call_operand.vmem [shape: f32[16,128], index: 0, kind: input, shape index: {}]   ;;  %s1270_s1 = inlined_call_operand.hbm [shape: f32[2,128,256], index: 1, kind: input, shape index: {}]   ;;  %s1271_s2 = inlined_call_operand.vmem [shape: f32[2,1,256], index: 2, kind: input, shape index: {}]   ;;  %s1272_s3 = inlined_call_operand.hbm [shape: f32[2,256,128], index: 3, kind: input, shape index: {}]   ;;  %s1273_s4 = inlined_call_operand.vmem [shape: f32[2,1,128], index: 4, kind: input, shape index: {}]   ;;  %s1274_s5 = inlined_call_operand.vmem [shape: f32[16,128], index: 5, kind: output, shape index: {}]  }
   0x1   :  { %11 = vsyncpa [#allocation5], 0  ;;  %s1141_s18 = smov 0  }
   0x2 LB: > { %s1104_s19 = smov [#allocation2]   ;;  %s1147_s21 = sadd.s32 4294967295, %s1102_s18   ;;  %s1102_s18 = sphi %s1141_s18, %s17_s18  }
   0x3   : > { %s170_s20 = sshll.u32 %s1104_s19, 4  ;;  %p785_p0 = scmp.ge.s32.totalorder %s1102_s18, 1  ;;  %s171_s20 = int_to_ptr.vmem [resolvable:$true] %s170_s20 }
   0x4   : > { %p158_p1 = scmp.lt.s32.totalorder %s1102_s18, 3  ;;  %p1275_p3 = scmp.eq.s32.totalorder %s1147_s21, 0 }
   0x5   : > { %s1105_s23 = smov [#allocation4]   ;;  %s1032_s28 = scalar_lea.hbm %s1270_s1, 8192 }
   0x6   : > { %p1151_p2 = pnand %p785_p0, %p158_p1  ;;  %s186_s24 = sshll.u32 %s1105_s23, 4  ;;  %s1164_s24 = int_to_ptr.vmem [resolvable:$true] %s186_s24 }
   0x7   : > { %p1033_p6 = scmp.ne.s32.totalorder %s1270_s1, %s1032_s28  ;;  %p1039_p10 = scmp.lt.u32.totalorder %s1032_s28, %s1270_s1 }
   0x8   : > { %s1277_s22 = scalar_select %p1151_p2, 1, 0 }
   0x9   : > { %p1006_p4 = pneg %p1151_p2 }
   0xb   : > { %p1160_p5 = pnand %p1275_p3, %p1006_p4 }
   0xd   : > { %p1034_p7 = pneg %p1160_p5 }
   0xf   : > { %p1035_p8 = pnand %p1034_p7, %p1033_p6 }
  0x11   : > { %p1036_p9 = pneg %p1035_p8 }
  0x13   : > { %p1041_p11 = pnand %p1039_p10, %p1036_p9 }
  0x15   : > { %1044 = shalt.err (!%p1041_p11)
}
  0x16   : > { %s1045_s8 = scalar_lea.vmem %s171_s20, 8192  ;;  %p1053_p1 = scmp.lt.s32.totalorder %s171_s20, %s171_s20 }
  0x17   : > { %p1046_p12 = scmp.ne.s32.totalorder %s171_s20, %s1045_s8  ;;  %p1054_p4 = scmp.lt.s32.totalorder %s1045_s8, %s1045_s8 }
  0x19   : > { %p1048_p13 = pnand %p1046_p12, %p1034_p7  ;;  %p1055_p3 = por %p1054_p4, %p1053_p1 }
  0x1b   : > { %p1049_p0 = pneg %p1048_p13 }
  0x1d   : > { %p1056_p2 = pnand %p1055_p3, %p1049_p0 }
  0x1f   : > { %1059 = shalt.err (!%p1056_p2)
}
  0x20   : > { %s1106_s9 = smov 256   ;;  %s1107_s10 = smov 16  }
  0x21   : > { %1009 = dma.hbm_to_vmem [thread:$0]  (!%p1160_p5), %s1270_s1, 8192, %s171_s20, [#allocation3], %s1106_s9, %s1106_s9, %s1107_s10  }
  0x22   : > { %s1060_s15 = scalar_lea.hbm %s1272_s3, 8192 }
  0x23   : > { %p1061_p6 = scmp.ne.s32.totalorder %s1272_s3, %s1060_s15  ;;  %p1067_p8 = scmp.lt.u32.totalorder %s1060_s15, %s1272_s3 }
  0x25   : > { %p1063_p2 = pnand %p1061_p6, %p1034_p7 }
  0x27   : > { %p1064_p3 = pneg %p1063_p2 }
  0x29   : > { %p1069_p9 = pnand %p1067_p8, %p1064_p3 }
  0x2b   : > { %1072 = shalt.err (!%p1069_p9)
}
  0x2c   : > { %s1073_s20 = scalar_lea.vmem %s1164_s24, 8192  ;;  %p1081_p13 = scmp.lt.s32.totalorder %s1164_s24, %s1164_s24 }
  0x2d   : > { %p1074_p10 = scmp.ne.s32.totalorder %s1164_s24, %s1073_s20  ;;  %p1082_p0 = scmp.lt.s32.totalorder %s1073_s20, %s1073_s20 }
  0x2f   : > { %p1076_p11 = pnand %p1074_p10, %p1034_p7  ;;  %p1083_p1 = por %p1082_p0, %p1081_p13 }
  0x31   : > { %p1077_p12 = pneg %p1076_p11 }
  0x33   : > { %p1084_p4 = pnand %p1083_p1, %p1077_p12 }
  0x35   : > { %1087 = shalt.err (!%p1084_p4)
}
  0x36   : > { %s1108_s26 = smov 128   ;;  %s1109_s27 = smov 8  }
  0x37   : > { %1012 = dma.hbm_to_vmem [thread:$0]  (!%p1160_p5), %s1272_s3, 8192, %s1164_s24, [#allocation5], %s1108_s26, %s1108_s26, %s1109_s27  }
  0x38   : > { %p1279_p6 = scmp.ne.s32.totalorder %s1277_s22, 0 }
  0x39   : > { %p1280_p7 = scmp.eq.s32.totalorder (!%p1279_p6), %s1147_s21, 0 }
  0x3a   : > { %212 = sbr.rel (%p1279_p6) target bundleno = 976 (0x3d0), region = 40 }
  0x41   : > { %1093 = dma.done.wait (%p1280_p7), [#allocation3], 8192   ;;  %p1281_p2 = pmov %p1280_p7 }
  0x43   : > { %1095 = vsyncadd (%p1281_p2), [#allocation3], 4294959104  ;;  %p1282_p3 = pmov %p1281_p2 }
  0x44   : > { %p1283_p8 = pmov %p1281_p2 }
  0x45   : > { %1097 = dma.done.wait (%p1282_p3), [#allocation5], 8192  }
  0x46   : > { %1099 = vsyncadd (%p1283_p8), [#allocation5], 4294959104  ;;  %v1110_v0 = vmov 0.0   ;;  %v252_v1 = vld [vmem:[#allocation2 + $0x8] sm:$0xff]  ;;  %v254_v2 = vld [vmem:[#allocation2 + $0x18] sm:$0xff]  ;;  %p242_p5 = scmp.lt.s32.totalorder %s1147_s21, 1 }
  0x47   : > { %359 = vmatprep.mubr.f32.mxu0 %v1110_v0  ;;  %v251_v3 = vld [vmem:[#allocation2] sm:$0xff]  ;;  %v870_v4 = vpack.c.bf16 %v254_v2, %v252_v1  ;;  %v253_v5 = vld [vmem:[#allocation2 + $0x10] sm:$0xff]  ;;  %v256_v6 = vld [vmem:[#allocation2 + $0x28] sm:$0xff] }
  0x48   : > { %v258_v7 = vld [vmem:[#allocation2 + $0x38] sm:$0xff]  ;;  %v872_v8 = vpack.c.bf16 %v253_v5, %v251_v3  ;;  %v255_v10 = vld [vmem:[#allocation2 + $0x20] sm:$0xff]  ;;  %v257_v11 = vld [vmem:[#allocation2 + $0x30] sm:$0xff]  ;;  %s1285_s21 = smov (!%p242_p5, %s1147_s21), 1 }
  0x49   : > { %v874_v9 = vpack.c.bf16 %v258_v7, %v256_v6  ;;  %v260_v12 = vld [vmem:[#allocation2 + $0x48] sm:$0xff]  ;;  %871 = vmatprep.subr.bf16.mxu0 %v870_v4  ;;  %v262_v13 = vld [vmem:[#allocation2 + $0x58] sm:$0xff]  ;;  %v876_v14 = vpack.c.bf16 %v257_v11, %v255_v10  ;;  %v259_v16 = vld [vmem:[#allocation2 + $0x40] sm:$0xff]  ;;  %s792_s22 = sshll.u32 %s1285_s21, 3 }
  0x4a   : > { %873 = vmatpush1.bf16.msra.mxu0 %v872_v8  ;;  %v878_v15 = vpack.c.bf16 %v262_v13, %v260_v12  ;;  %v261_v17 = vld [vmem:[#allocation2 + $0x50] sm:$0xff]  ;;  %v264_v18 = vld [vmem:[#allocation2 + $0x68] sm:$0xff]  ;;  %v266_v19 = vld [vmem:[#allocation2 + $0x78] sm:$0xff]  ;;  %s245_s30 = scalar_lea.vmem %s1269_s0, %s792_s22  ;;  %s249_s16 = scalar_lea.vmem %s1274_s5, %s792_s22 }
  0x4b   : > { %875 = vmatprep.subr.bf16.mxu0 %v874_v9  ;;  %v880_v20 = vpack.c.bf16 %v261_v17, %v259_v16  ;;  %v882_v21 = vpack.c.bf16 %v266_v19, %v264_v18  ;;  %v263_v22 = vld [vmem:[#allocation2 + $0x60] sm:$0xff]  ;;  %v265_v23 = vld [vmem:[#allocation2 + $0x70] sm:$0xff]  ;;  %v268_v24 = vld [vmem:[#allocation2 + $0x88] sm:$0xff] }
  0x4c   : > { %v270_v25 = vld [vmem:[#allocation2 + $0x98] sm:$0xff]  ;;  %v267_v26 = vld [vmem:[#allocation2 + $0x80] sm:$0xff]  ;;  %v269_v27 = vld [vmem:[#allocation2 + $0x90] sm:$0xff]  ;;  %v884_v31 = vpack.c.bf16 %v265_v23, %v263_v22 }
  0x4d   : > { %v384_v28 = vld [vmem:[#allocation4 + $0x80] sm:$0xff]  ;;  %v385_v29 = vld [vmem:[#allocation4 + $0x88] sm:$0xff]  ;;  %v386_v34 = vld [vmem:[#allocation4 + $0x90] sm:$0xff]  ;;  %v886_v36 = vpack.c.bf16 %v270_v25, %v268_v24  ;;  %v888_v46 = vpack.c.bf16 %v269_v27, %v267_v26 }
  0x4e   : > { %877 = vmatpush1.bf16.msra.mxu0 %v876_v14  ;;  %v368_v30 = vld [vmem:[#allocation4] sm:$0xff]  ;;  %v902_v32 = vpack.c.bf16 %v385_v29, %v384_v28  ;;  %v369_v33 = vld [vmem:[#allocation4 + $0x8] sm:$0xff]  ;;  %v387_v35 = vld [vmem:[#allocation4 + $0x98] sm:$0xff] }
  0x4f   : > { %879 = vmatprep.subr.bf16.mxu0 %v878_v15  ;;  %v904_v37 = vpack.c.bf16 %v369_v33, %v368_v30  ;;  %v906_v38 = vpack.c.bf16 %v387_v35, %v386_v34  ;;  %v370_v39 = vld [vmem:[#allocation4 + $0x10] sm:$0xff]  ;;  %v371_v40 = vld [vmem:[#allocation4 + $0x18] sm:$0xff]  ;;  %v388_v41 = vld [vmem:[#allocation4 + $0xa0] sm:$0xff] }
  0x50   : > { %v272_v42 = vld [vmem:[#allocation2 + $0xa8] sm:$0xff]  ;;  %v274_v43 = vld [vmem:[#allocation2 + $0xb8] sm:$0xff]  ;;  %903 = vmatprep.subr.bf16.mxu1 %v902_v32  ;;  %v908_v45 = vpack.c.bf16 %v371_v40, %v370_v39  ;;  %v271_v47 = vld [vmem:[#allocation2 + $0xa0] sm:$0xff] }
  0x51   : > { %v389_v44 = vld [vmem:[#allocation4 + $0xa8] sm:$0xff]  ;;  %905 = vmatpush3.bf16.msra.mxu1 %v904_v37  ;;  %v372_v49 = vld [vmem:[#allocation4 + $0x20] sm:$0xff]  ;;  %v890_v51 = vpack.c.bf16 %v274_v43, %v272_v42  ;;  %v273_v52 = vld [vmem:[#allocation2 + $0xb0] sm:$0xff] }
  0x52   : > { %881 = vmatpush1.bf16.msra.mxu0 %v880_v20  ;;  %907 = vmatprep.subr.bf16.mxu1 %v906_v38  ;;  %v910_v48 = vpack.c.bf16 %v389_v44, %v388_v41  ;;  %v373_v50 = vld [vmem:[#allocation4 + $0x28] sm:$0xff]  ;;  %v390_v53 = vld [vmem:[#allocation4 + $0xb0] sm:$0xff]  ;;  %v391_v54 = vld [vmem:[#allocation4 + $0xb8] sm:$0xff]  ;;  %v892_v58 = vpack.c.bf16 %v273_v52, %v271_v47 }
  0x53   : > { %883 = vmatprep.subr.bf16.mxu0 %v882_v21  ;;  %v276_v55 = vld [vmem:[#allocation2 + $0xc8] sm:$0xff]  ;;  %v278_v56 = vld [vmem:[#allocation2 + $0xd8] sm:$0xff]  ;;  %v912_v57 = vpack.c.bf16 %v373_v50, %v372_v49  ;;  %v275_v59 = vld [vmem:[#allocation2 + $0xc0] sm:$0xff]  ;;  %v914_v60 = vpack.c.bf16 %v391_v54, %v390_v53 }
  0x54   : > { %v374_v61 = vld [vmem:[#allocation4 + $0x30] sm:$0xff]  ;;  %v375_v62 = vld [vmem:[#allocation4 + $0x38] sm:$0xff]  ;;  %v894_v63 = vpack.c.bf16 %v278_v56, %v276_v55  ;;  %v392_v2 = vld [vmem:[#allocation4 + $0xc0] sm:$0xff] }
  0x55   : > { %909 = vmatpush3.bf16.msra.mxu1 %v908_v45  ;;  %v277_v1 = vld [vmem:[#allocation2 + $0xd0] sm:$0xff]  ;;  %v393_v3 = vld [vmem:[#allocation4 + $0xc8] sm:$0xff]  ;;  %v282_v5 = vld [vmem:[#allocation2 + $0xf8] sm:$0xff]  ;;  %v916_v6 = vpack.c.bf16 %v375_v62, %v374_v61 }
  0x56   : > { %885 = vmatpush1.bf16.msra.mxu0 %v884_v31  ;;  %911 = vmatprep.subr.bf16.mxu1 %v910_v48  ;;  %v280_v4 = vld [vmem:[#allocation2 + $0xe8] sm:$0xff]  ;;  %v896_v7 = vpack.c.bf16 %v277_v1, %v275_v59  ;;  %v279_v8 = vld [vmem:[#allocation2 + $0xe0] sm:$0xff]  ;;  %v918_v9 = vpack.c.bf16 %v393_v3, %v392_v2  ;;  %v281_v13 = vld [vmem:[#allocation2 + $0xf0] sm:$0xff] }
  0x57   : > { %887 = vmatprep.subr.bf16.mxu0 %v886_v36  ;;  %v376_v10 = vld [vmem:[#allocation4 + $0x40] sm:$0xff]  ;;  %v377_v11 = vld [vmem:[#allocation4 + $0x48] sm:$0xff]  ;;  %v898_v12 = vpack.c.bf16 %v282_v5, %v280_v4  ;;  %v394_v14 = vld [vmem:[#allocation4 + $0xd0] sm:$0xff]  ;;  %v900_v17 = vpack.c.bf16 %v281_v13, %v279_v8  ;;  %v285_v13 = vlaneseq }
  0x58   : > { %v395_v15 = vld [vmem:[#allocation4 + $0xd8] sm:$0xff]  ;;  %v920_v16 = vpack.c.bf16 %v377_v11, %v376_v10  ;;  %v378_v19 = vld [vmem:[#allocation4 + $0x50] sm:$0xff]  ;;  %v396_v21 = vld [vmem:[#allocation4 + $0xe0] sm:$0xff] }
  0x59   : > { %913 = vmatpush3.bf16.msra.mxu1 %v912_v57  ;;  %v922_v18 = vpack.c.bf16 %v395_v15, %v394_v14  ;;  %v379_v20 = vld [vmem:[#allocation4 + $0x58] sm:$0xff]  ;;  %v397_v22 = vld [vmem:[#allocation4 + $0xe8] sm:$0xff]  ;;  %v250_v24 = vld [vmem:[%s245_s30] sm:$0xff]  ;;  %v1237_v14 = vshrl.u32 %v285_v13, 7 }
  0x5a   : > { %889 = vmatpush1.bf16.msra.mxu0 %v888_v46  ;;  %915 = vmatprep.subr.bf16.mxu1 %v914_v60  ;;  %v924_v23 = vpack.c.bf16 %v379_v20, %v378_v19  ;;  %v926_v25 = vpack.c.bf16 %v397_v22, %v396_v21  ;;  %v380_v26 = vld [vmem:[#allocation4 + $0x60] sm:$0xff]  ;;  %v381_v27 = vld [vmem:[#allocation4 + $0x68] sm:$0xff]  ;;  %v398_v29 = vld [vmem:[#allocation4 + $0xf0] sm:$0xff] }
  0x5b   : > { %891 = vmatprep.subr.bf16.mxu0 %v890_v51  ;;  %v928_v28 = vpack.c.bf16 %v381_v27, %v380_v26  ;;  %v399_v30 = vld [vmem:[#allocation4 + $0xf8] sm:$0xff]  ;;  %v382_v32 = vld [vmem:[#allocation4 + $0x70] sm:$0xff]  ;;  %v479_v35 = vld [vmem:[#allocation2 + $0x108] sm:$0xff]  ;;  %v287_v15 = vsub.s32 0, %v1237_v14 }
  0x5c   : > { %v930_v31 = vpack.c.bf16 %v399_v30, %v398_v29  ;;  %v383_v33 = vld [vmem:[#allocation4 + $0x78] sm:$0xff]  ;;  %v478_v37 = vld [vmem:[#allocation2 + $0x100] sm:$0xff]  ;;  %v480_v39 = vld [vmem:[#allocation2 + $0x110] sm:$0xff] }
  0x5d   : > { %917 = vmatpush3.bf16.msra.mxu1 %v916_v6  ;;  %v932_v34 = vpack.c.bf16 %v383_v33, %v382_v32  ;;  %v481_v36 = vld [vmem:[#allocation2 + $0x118] sm:$0xff]  ;;  %v483_v40 = vld [vmem:[#allocation2 + $0x128] sm:$0xff]  ;;  %v482_v43 = vld [vmem:[#allocation2 + $0x120] sm:$0xff] }
  0x5e   : > { %893 = vmatpush1.bf16.msra.mxu0 %v892_v58  ;;  %919 = vmatprep.subr.bf16.mxu1 %v918_v9  ;;  %v934_v38 = vpack.c.bf16 %v481_v36, %v479_v35  ;;  %v485_v41 = vld [vmem:[#allocation2 + $0x138] sm:$0xff]  ;;  %v484_v44 = vld [vmem:[#allocation2 + $0x130] sm:$0xff]  ;;  %v487_v45 = vld [vmem:[#allocation2 + $0x148] sm:$0xff] }
  0x5f   : > { %895 = vmatprep.subr.bf16.mxu0 %v894_v63  ;;  %v938_v42 = vpack.c.bf16 %v485_v41, %v483_v40  ;;  %v489_v46 = vld [vmem:[#allocation2 + $0x158] sm:$0xff]  ;;  %v940_v47 = vpack.c.bf16 %v484_v44, %v482_v43  ;;  %v486_v49 = vld [vmem:[#allocation2 + $0x140] sm:$0xff]  ;;  %v488_v50 = vld [vmem:[#allocation2 + $0x150] sm:$0xff] }
  0x60   : > { %v942_v48 = vpack.c.bf16 %v489_v46, %v487_v45  ;;  %v491_v51 = vld [vmem:[#allocation2 + $0x168] sm:$0xff]  ;;  %v493_v52 = vld [vmem:[#allocation2 + $0x178] sm:$0xff]  ;;  %v944_v53 = vpack.c.bf16 %v488_v50, %v486_v49  ;;  %v490_v55 = vld [vmem:[#allocation2 + $0x160] sm:$0xff] }
  0x61   : > { %921 = vmatpush3.bf16.msra.mxu1 %v920_v16  ;;  %v946_v54 = vpack.c.bf16 %v493_v52, %v491_v51  ;;  %v492_v56 = vld [vmem:[#allocation2 + $0x170] sm:$0xff]  ;;  %v495_v57 = vld [vmem:[#allocation2 + $0x188] sm:$0xff]  ;;  %v497_v58 = vld [vmem:[#allocation2 + $0x198] sm:$0xff] }
  0x62   : > { %897 = vmatpush1.bf16.msra.mxu0 %v896_v7  ;;  %923 = vmatprep.subr.bf16.mxu1 %v922_v18  ;;  %v948_v59 = vpack.c.bf16 %v492_v56, %v490_v55  ;;  %v950_v60 = vpack.c.bf16 %v497_v58, %v495_v57  ;;  %v494_v61 = vld [vmem:[#allocation2 + $0x180] sm:$0xff]  ;;  %v496_v62 = vld [vmem:[#allocation2 + $0x190] sm:$0xff]  ;;  %v499_v63 = vld [vmem:[#allocation2 + $0x1a8] sm:$0xff] }
  0x63   : > { %899 = vmatprep.subr.bf16.mxu0 %v898_v12  ;;  %v501_v1 = vld [vmem:[#allocation2 + $0x1b8] sm:$0xff]  ;;  %v952_v2 = vpack.c.bf16 %v496_v62, %v494_v61  ;;  %v498_v4 = vld [vmem:[#allocation2 + $0x1a0] sm:$0xff]  ;;  %v500_v5 = vld [vmem:[#allocation2 + $0x1b0] sm:$0xff] }
  0x64   : > { %v954_v3 = vpack.c.bf16 %v501_v1, %v499_v63  ;;  %v503_v6 = vld [vmem:[#allocation2 + $0x1c8] sm:$0xff]  ;;  %v505_v7 = vld [vmem:[#allocation2 + $0x1d8] sm:$0xff]  ;;  %v956_v8 = vpack.c.bf16 %v500_v5, %v498_v4  ;;  %v502_v10 = vld [vmem:[#allocation2 + $0x1c0] sm:$0xff] }
  0x65   : > { %925 = vmatpush3.bf16.msra.mxu1 %v924_v23  ;;  %v958_v9 = vpack.c.bf16 %v505_v7, %v503_v6  ;;  %v504_v11 = vld [vmem:[#allocation2 + $0x1d0] sm:$0xff]  ;;  %v283_v16 = vld [vmem:[%s1271_s2] sm:$0x3]  ;;  %v507_v26 = vld [vmem:[#allocation2 + $0x1e8] sm:$0xff] }
  0x66   : > { %901 = vmatpush1.bf16.msra.mxu0 %v900_v17  ;;  %927 = vmatprep.subr.bf16.mxu1 %v926_v25  ;;  %v960_v12 = vpack.c.bf16 %v504_v11, %v502_v10  ;;  %v291_v17 = vsub.s32 1, %v1237_v14  ;;  %v288_v18 = vrot.slane %v283_v16, %v287_v15  ;;  %v509_v27 = vld [vmem:[#allocation2 + $0x1f8] sm:$0xff]  ;;  %v506_v29 = vld [vmem:[#allocation2 + $0x1e0] sm:$0xff]  ;;  %v508_v30 = vld [vmem:[#allocation2 + $0x1f0] sm:$0xff] }
  0x67   : > { %935 = vmatprep.subr.bf16.mxu0 %v934_v38  ;;  %v613_v32 = vld [vmem:[#allocation4 + $0x180] sm:$0xff]  ;;  %v614_v33 = vld [vmem:[#allocation4 + $0x188] sm:$0xff]  ;;  %v616_v38 = vld [vmem:[#allocation4 + $0x198] sm:$0xff] }
  0x68   : > { %v292_v19 = vrot.slane %v283_v16, %v291_v17  ;;  %v966_v35 = vpack.c.bf16 %v614_v33, %v613_v32  ;;  %v598_v36 = vld [vmem:[#allocation4 + $0x108] sm:$0xff]  ;;  %v599_v41 = vld [vmem:[#allocation4 + $0x110] sm:$0xff]  ;;  %v601_v46 = vld [vmem:[#allocation4 + $0x120] sm:$0xff] }
  0x69   : > { %360 = vmatmul.mubr.f32.vlgmr.msra.gmra.mrb[0].mxu0 %v250_v24  ;;  %929 = vmatpush3.bf16.msra.mxu1 %v928_v28  ;;  %v962_v28 = vpack.c.bf16 %v509_v27, %v507_v26  ;;  %v618_v43 = vld [vmem:[#allocation4 + $0x1a8] sm:$0xff]  ;;  %v620_v49 = vld [vmem:[#allocation4 + $0x1b8] sm:$0xff]  ;;  %v603_v52 = vld [vmem:[#allocation4 + $0x130] sm:$0xff] }
  0x6a   : > { %587 = vmatprep.mubr.f32.mxu0 %v1110_v0  ;;  %931 = vmatprep.subr.bf16.mxu1 %v930_v31  ;;  %v936_v0 = vpack.c.bf16 %v480_v39, %v478_v37  ;;  %v964_v31 = vpack.c.bf16 %v508_v30, %v506_v29  ;;  %v615_v37 = vld [vmem:[#allocation4 + $0x190] sm:$0xff]  ;;  %v622_v55 = vld [vmem:[#allocation4 + $0x1c8] sm:$0xff]  ;;  %v605_v58 = vld [vmem:[#allocation4 + $0x140] sm:$0xff] }
  0x6b   : > { %v970_v40 = vpack.c.bf16 %v616_v38, %v615_v37  ;;  %v624_v61 = vld [vmem:[#allocation4 + $0x1d8] sm:$0xff]  ;;  %v607_v1 = vld [vmem:[#allocation4 + $0x150] sm:$0xff]  ;;  %v626_v4 = vld [vmem:[#allocation4 + $0x1e8] sm:$0xff] }
  0x6c   : > { %937 = vmatpush1.bf16.msra.mxu0 %v936_v0  ;;  %v600_v0 = vld [vmem:[#allocation4 + $0x118] sm:$0xff]  ;;  %v610_v13 = vld [vmem:[#allocation4 + $0x168] sm:$0xff] }
  0x6d   : > { %933 = vmatpush3.bf16.msra.mxu1 %v932_v34  ;;  %939 = vmatprep.subr.bf16.mxu0 %v938_v42  ;;  %v597_v34 = vld [vmem:[#allocation4 + $0x100] sm:$0xff]  ;;  %v972_v44 = vpack.c.bf16 %v600_v0, %v599_v41 }
  0x6e   : > { %v968_v39 = vpack.c.bf16 %v598_v36, %v597_v34  ;;  %v617_v42 = vld [vmem:[#allocation4 + $0x1a0] sm:$0xff]  ;;  %967 = vmatprep.subr.bf16.mxu1 %v966_v35 }
  0x6f   : > { %v974_v45 = vpack.c.bf16 %v618_v43, %v617_v42  ;;  %v797_v34 = vld [vmem:[%s1273_s4 + $0x1] ss:$0 sm:$0xff] }
  0x70   : > { %941 = vmatpush1.bf16.msra.mxu0 %v940_v47  ;;  %v602_v47 = vld [vmem:[#allocation4 + $0x128] sm:$0xff] }
  0x71   : > { %943 = vmatprep.subr.bf16.mxu0 %v942_v48  ;;  %v619_v48 = vld [vmem:[#allocation4 + $0x1b0] sm:$0xff]  ;;  %v976_v50 = vpack.c.bf16 %v602_v47, %v601_v46 }
  0x72   : > { %v978_v51 = vpack.c.bf16 %v620_v49, %v619_v48 }
  0x74   : > { %945 = vmatpush1.bf16.msra.mxu0 %v944_v53  ;;  %v604_v53 = vld [vmem:[#allocation4 + $0x138] sm:$0xff] }
  0x75   : > { %947 = vmatprep.subr.bf16.mxu0 %v946_v54  ;;  %v621_v54 = vld [vmem:[#allocation4 + $0x1c0] sm:$0xff]  ;;  %v980_v56 = vpack.c.bf16 %v604_v53, %v603_v52 }
  0x76   : > { %v982_v57 = vpack.c.bf16 %v622_v55, %v621_v54 }
  0x78   : > { %949 = vmatpush1.bf16.msra.mxu0 %v948_v59  ;;  %v606_v59 = vld [vmem:[#allocation4 + $0x148] sm:$0xff] }
  0x79   : > { %951 = vmatprep.subr.bf16.mxu0 %v950_v60  ;;  %v623_v60 = vld [vmem:[#allocation4 + $0x1d0] sm:$0xff]  ;;  %v984_v62 = vpack.c.bf16 %v606_v59, %v605_v58 }
  0x7a   : > { %v986_v63 = vpack.c.bf16 %v624_v61, %v623_v60 }
  0x7c   : > { %953 = vmatpush1.bf16.msra.mxu0 %v952_v2  ;;  %v608_v2 = vld [vmem:[#allocation4 + $0x158] sm:$0xff] }
  0x7d   : > { %955 = vmatprep.subr.bf16.mxu0 %v954_v3  ;;  %v625_v3 = vld [vmem:[#allocation4 + $0x1e0] sm:$0xff]  ;;  %v988_v5 = vpack.c.bf16 %v608_v2, %v607_v1 }
  0x7e   : > { %v990_v6 = vpack.c.bf16 %v626_v4, %v625_v3 }
  0x80   : > { %957 = vmatpush1.bf16.msra.mxu0 %v956_v8  ;;  %v794_v8 = vld [vmem:[%s1273_s4] ss:$0 sm:$0xff] }
  0x81   : > { %959 = vmatprep.subr.bf16.mxu0 %v958_v9 }
  0x84   : > { %961 = vmatpush1.bf16.msra.mxu0 %v960_v12  ;;  %v609_v12 = vld [vmem:[#allocation4 + $0x160] sm:$0xff] }
  0x85   : > { %963 = vmatprep.subr.bf16.mxu0 %v962_v28  ;;  %v992_v16 = vpack.c.bf16 %v610_v13, %v609_v12 }
  0x88   : > { %965 = vmatpush1.bf16.msra.mxu0 %v964_v31 }
 0x13c   : > { %v361_v20 = vpop.f32.mrb[0].mxu0 }
 0x13d   : > { %v362_v21 = vadd.f32 %v361_v20, %v288_v18  ;;  %v363_v22 = vpop.f32.mrb[1].mxu0  ;;  %v627_v18 = vld [vmem:[#allocation4 + $0x1f0] sm:$0xff] }
 0x13e   : > { %v364_v23 = vadd.f32 %v363_v22, %v292_v19  ;;  %v628_v19 = vld [vmem:[#allocation4 + $0x1f8] sm:$0xff] }
 0x13f   : > { %v366_v25 = vmax.f32 %v362_v21, 0.0  ;;  %v994_v20 = vpack.c.bf16 %v628_v19, %v627_v18  ;;  %v611_v21 = vld [vmem:[#allocation4 + $0x170] sm:$0xff]  ;;  %v612_v22 = vld [vmem:[#allocation4 + $0x178] sm:$0xff] }
 0x140   : > { %v367_v24 = vmax.f32 %v364_v23, 0.0  ;;  %v996_v23 = vpack.c.bf16 %v612_v22, %v611_v21 }
 0x142   : > { %471 = vmatprep.mubr.f32.mxu1 %v367_v24  ;;  %v795_v24 = vld [vmem:[%s1271_s2 + $0x2] sm:$0x3] }
 0x143   : > { %472 = vmatmul.mubr.f32.vlgmr.msra.gmra.mrb[0].mxu1 %v366_v25  ;;  %v516_v25 = vrot.slane %v795_v24, %v287_v15  ;;  %v520_v26 = vrot.slane %v795_v24, %v291_v17 }
 0x144   : > { %969 = vmatpush3.bf16.msra.mxu1 %v968_v39 }
 0x145   : > { %971 = vmatprep.subr.bf16.mxu1 %v970_v40 }
 0x148   : > { %973 = vmatpush3.bf16.msra.mxu1 %v972_v44 }
 0x149   : > { %975 = vmatprep.subr.bf16.mxu1 %v974_v45 }
 0x14c   : > { %977 = vmatpush3.bf16.msra.mxu1 %v976_v50 }
 0x14d   : > { %979 = vmatprep.subr.bf16.mxu1 %v978_v51 }
 0x150   : > { %981 = vmatpush3.bf16.msra.mxu1 %v980_v56 }
 0x151   : > { %983 = vmatprep.subr.bf16.mxu1 %v982_v57 }
 0x154   : > { %985 = vmatpush3.bf16.msra.mxu1 %v984_v62 }
 0x155   : > { %987 = vmatprep.subr.bf16.mxu1 %v986_v63 }
 0x158   : > { %989 = vmatpush3.bf16.msra.mxu1 %v988_v5 }
 0x159   : > { %991 = vmatprep.subr.bf16.mxu1 %v990_v6 }
 0x15c   : > { %993 = vmatpush3.bf16.msra.mxu1 %v992_v16 }
 0x15d   : > { %995 = vmatprep.subr.bf16.mxu1 %v994_v20 }
 0x160   : > { %997 = vmatpush3.bf16.msra.mxu1 %v996_v23 }
 0x216   : > { %v832_v7 = vpop.f32.mrb[0].mxu1 }
 0x217   : > { %v833_v9 = vpop.f32.mrb[1].mxu1 }
 0x218   : > { %v834_v10 = vadd.f32 %v833_v9, %v832_v7 }
 0x21a   : > { %v474_v11 = vadd.f32 %v834_v10, %v794_v8 }
 0x21c   : > { %588 = vmatmul.mubr.f32.vlgmr.msra.gmra.mrb[2].mxu0 %v474_v11 }
 0x2ef   : > { %v589_v27 = vpop.f32.mrb[2].mxu0 }
 0x2f0   : > { %v590_v28 = vadd.f32 %v589_v27, %v516_v25  ;;  %v591_v29 = vpop.f32.mrb[3].mxu0 }
 0x2f1   : > { %v592_v30 = vadd.f32 %v591_v29, %v520_v26 }
 0x2f2   : > { %v594_v32 = vmax.f32 %v590_v28, 0.0 }
 0x2f3   : > { %v595_v31 = vmax.f32 %v592_v30, 0.0 }
 0x2f5   : > { %701 = vmatprep.mubr.f32.mxu1 %v595_v31 }
 0x2f6   : > { %702 = vmatmul.mubr.f32.vlgmr.msra.gmra.mrb[2].mxu1 %v594_v32 }
 0x3c9   : > { %v867_v33 = vpop.f32.mrb[2].mxu1 }
 0x3ca   : > { %v868_v35 = vpop.f32.mrb[3].mxu1 }
 0x3cb   : > { %v869_v36 = vadd.f32 %v868_v35, %v867_v33 }
 0x3cd   : > { %v704_v14 = vadd.f32 %v869_v36, %v797_v34 }
 0x3cf   : > { %707 = vst [vmem:[%s249_s16] sm:$0xff] %v704_v14 }
 0x3d0 PF: > { %s17_s18 = sadd.s32 1, %s1102_s18  }
 0x3d1   : > { %p14_p9 = scmp.ge.s32.totalorder %s17_s18, 4  }
 0x3d3   :  { %16 = sbr.rel (!%p14_p9) target bundleno = 2 (0x2), region = 83 }
 0x3da   :  { %727 = vsyncpa [#allocation3], 1 }
 0x3db   :  { %729 = vsyncpa [#allocation3 + $0x1], 1 }
 0x3dc   :  { %730 = vsyncpa [#allocation5], 1 }

</bundles_post_ra>
